<compile_context>
chip_gen: v6e
topology: v6e:2x2x1
jax: 0.10.0
libtpu: 0.0.40
codegen_flags: <defaults>
</compile_context>

<pallas_src>
import functools
import math

import jax
import jax.numpy as jnp
from jax.experimental import pallas as pl
from jax.experimental.pallas import tpu as pltpu


def bert_attention_kernel(h_ref, m_ref, wqkv_ref, bqkv_ref, wo_ref, bo_ref,
                          gamma_ref, beta_ref, *rest,
                          num_heads, head_dim, q_tile, eps, with_probs):
    if with_probs:
        out_ref, probs_ref, q_scr, k_scr, v_scr, ctx_scr = rest
    else:
        out_ref, q_scr, k_scr, v_scr, ctx_scr = rest
        probs_ref = None

    qt = pl.program_id(1)
    H = num_heads * head_dim

    # --- per-batch fused QKV projection, computed once at the first query tile ---
    @pl.when(qt == 0)
    def _():
        xb = h_ref[0].astype(jnp.bfloat16)                     # (S, H) bf16
        qkv = jnp.dot(xb, wqkv_ref[...],
                      preferred_element_type=jnp.float32) + bqkv_ref[...]
        qkv = qkv.astype(jnp.bfloat16)                         # cast once; f32 dies here
        for h in range(num_heads):
            lo = h * head_dim
            q_scr[h] = qkv[:, lo:lo + head_dim]                # Q is pre-scaled by 1/sqrt(hd)
            k_scr[h] = qkv[:, H + lo:H + lo + head_dim]
            v_scr[h] = qkv[:, 2 * H + lo:2 * H + lo + head_dim]

    # --- per query-tile attention ---
    row0 = pl.multiple_of(qt * q_tile, q_tile)
    x_tile = h_ref[0, pl.ds(row0, q_tile), :]                  # (TQ, H) f32 residual rows
    mask = m_ref[0]                                            # (1, S) f32 padding mask

    qh = q_scr[:, pl.ds(row0, q_tile), :]                      # (NH, TQ, hd) bf16
    kh = k_scr[...]                                            # (NH, S,  hd) bf16
    vh = v_scr[...]                                            # (NH, S,  hd) bf16

    # Batched scores for all heads (scale already folded into Wq on the host).
    s = jnp.einsum('hqd,hkd->hqk', qh, kh,
                   preferred_element_type=jnp.float32)         # (NH, TQ, S) f32
    s = s + mask                                               # single hoisted mask add
    s = s - jnp.max(s, axis=-1, keepdims=True)                 # stable softmax (f32)
    p = jnp.exp(s)
    denom = jnp.sum(p, axis=-1, keepdims=True)
    p = p * pl.reciprocal(denom, approx=False)

    if with_probs:
        probs_ref[0] = p.astype(probs_ref.dtype)

    # Batched context for all heads.
    ctx = jnp.einsum('hqk,hkd->hqd', p.astype(jnp.bfloat16), vh,
                     preferred_element_type=jnp.float32)       # (NH, TQ, hd) f32

    # Merge heads back to a lane-dense (TQ, H) bf16 slab for the output projection.
    for h in range(num_heads):
        lo = h * head_dim
        ctx_scr[:, lo:lo + head_dim] = ctx[h].astype(jnp.bfloat16)

    # BertSelfOutput: dense -> (+ residual) -> LayerNorm (all f32 after the matmul).
    o = jnp.dot(ctx_scr[...], wo_ref[...],
                preferred_element_type=jnp.float32) + bo_ref[...]
    y = o + x_tile
    mean = jnp.mean(y, axis=-1, keepdims=True)
    var = jnp.mean(jnp.square(y - mean), axis=-1, keepdims=True)   # biased var (torch LN)
    yn = (y - mean) * jax.lax.rsqrt(var + eps)
    out_ref[0] = (yn * gamma_ref[...] + beta_ref[...]).astype(out_ref.dtype)


def prepare_params(params, *, num_heads):
    """Host-side weight fusion, done ONCE (not per forward call).

    Folds 1/sqrt(head_dim) into the Q columns of the fused (H, 3H) Wqkv and its bias.
    """
    f32, bf16 = jnp.float32, jnp.bfloat16
    H = params["wq"].shape[0]
    head_dim = H // num_heads
    scale = 1.0 / math.sqrt(head_dim)
    wqkv = jnp.concatenate(
        [params["wq"] * scale, params["wk"], params["wv"]], axis=1).astype(bf16)
    bqkv = jnp.concatenate(
        [params["bq"] * scale, params["bk"], params["bv"]], axis=1).astype(f32)
    return {
        "wqkv": wqkv,                                   # (H, 3H) bf16
        "bqkv": bqkv,                                   # (1, 3H) f32
        "wo": params["wo"].astype(bf16),                # (H, H)  bf16
        "bo": params["bo"].astype(f32),                 # (1, H)  f32
        "ln_gamma": params["ln_gamma"].astype(f32),
        "ln_beta": params["ln_beta"].astype(f32),
    }


def _pick_q_tile(S, q_tile=None):
    if q_tile is not None:
        assert S % q_tile == 0, "S must be a multiple of q_tile"
        return q_tile
    if S <= 256:
        return S
    for t in (256, 128, 64):
        if S % t == 0:
            return t
    return S  # TODO(synk): pad/mask ragged sequence lengths instead of one huge tile.


def _vmem_budget(S, H, NH, hd, q_tile, with_probs, probs_bytes):
    """Rough scoped-VMEM budget (bytes): block buffers + scratch + f32 intermediates."""
    bf, f32 = 2, 4
    est = 0
    est += 2 * S * H * f32                       # hidden block x2 buffers
    est += 2 * S * f32                           # mask block
    est += H * (3 * H) * bf + (3 * H) * f32      # fused Wqkv / bias (single-buffered)
    est += H * H * bf + 3 * H * f32              # Wo, bo, gamma, beta (single-buffered)
    est += 2 * q_tile * H * f32                  # out block x2
    if with_probs:
        est += 2 * NH * q_tile * S * probs_bytes  # probs block x2
    est += 3 * NH * S * hd * bf                  # q/k/v scratch
    est += q_tile * H * bf                       # merged-context scratch
    est += 3 * NH * q_tile * S * f32             # scores/exp/probs f32 intermediates
    est = int(est * 1.25) + (4 << 20)            # headroom
    return max(min(est, 64 << 20), 32 << 20)     # safe on v5e/v6e/v7x


def bert_attention(hidden, attention_mask, params, *, num_heads, eps=1e-12,
                   output_attentions=True, probs_dtype=jnp.bfloat16, q_tile=None):
    B, S, H = hidden.shape
    head_dim = H // num_heads
    f32 = jnp.float32

    if "wqkv" not in params:                     # allow raw params; fusion hoisted otherwise
        params = prepare_params(params, num_heads=num_heads)

    tq = _pick_q_tile(S, q_tile)
    n_qt = S // tq

    mask2d = attention_mask.reshape(B, 1, S).astype(f32)

    kern = functools.partial(bert_attention_kernel,
                             num_heads=num_heads, head_dim=head_dim, q_tile=tq,
                             eps=eps, with_probs=output_attentions)

    def wspec(shape):
        # Grid-invariant weight block: single-buffered (no wasted second copy).
        return pl.BlockSpec(shape, lambda b, qt: (0,) * len(shape),
                            pipeline_mode=pl.Buffered(1))

    in_specs = [
        pl.BlockSpec((1, S, H), lambda b, qt: (b, 0, 0)),     # hidden_states (f32)
        pl.BlockSpec((1, 1, S), lambda b, qt: (b, 0, 0)),     # additive padding mask
        wspec((H, 3 * H)),                                    # fused Wqkv (bf16, Q pre-scaled)
        wspec((1, 3 * H)),                                    # fused bias (f32)
        wspec((H, H)),                                        # Wo (bf16)
        wspec((1, H)),                                        # bo
        wspec((1, H)),                                        # LN gamma
        wspec((1, H)),                                        # LN beta
    ]

    out_shapes = [jax.ShapeDtypeStruct((B, S, H), f32)]
    out_specs = [pl.BlockSpec((1, tq, H), lambda b, qt: (b, qt, 0))]
    if output_attentions:
        out_shapes.append(jax.ShapeDtypeStruct((B, num_heads, S, S), probs_dtype))
        out_specs.append(
            pl.BlockSpec((1, num_heads, tq, S), lambda b, qt: (b, 0, qt, 0)))

    vmem_bytes = _vmem_budget(S, H, num_heads, head_dim, tq, output_attentions,
                              jnp.dtype(probs_dtype).itemsize)

    result = pl.pallas_call(
        kern,
        out_shape=tuple(out_shapes),
        grid_spec=pltpu.PrefetchScalarGridSpec(
            num_scalar_prefetch=0,
            grid=(B, n_qt),
            in_specs=in_specs,
            out_specs=out_specs,
            scratch_shapes=[
                pltpu.VMEM((num_heads, S, head_dim), jnp.bfloat16),   # q heads (pre-scaled)
                pltpu.VMEM((num_heads, S, head_dim), jnp.bfloat16),   # k heads
                pltpu.VMEM((num_heads, S, head_dim), jnp.bfloat16),   # v heads
                pltpu.VMEM((tq, H), jnp.bfloat16),                    # merged context tile
            ]),
        compiler_params=pltpu.CompilerParams(
            dimension_semantics=("parallel", "arbitrary"),
            vmem_limit_bytes=vmem_bytes),
    )(hidden.astype(f32), mask2d, params["wqkv"], params["bqkv"], params["wo"],
      params["bo"], params["ln_gamma"], params["ln_beta"])

    if output_attentions:
        out, probs = result
        return out, probs
    (out,) = result
    return out, None


def bert_attention_ref(hidden, attention_mask, params, *, num_heads, eps=1e-12):
    """Pure-JAX f32 reference mirroring the PyTorch forward (eval mode)."""
    B, S, H = hidden.shape
    hd = H // num_heads
    q = hidden @ params["wq"] + params["bq"][0]
    k = hidden @ params["wk"] + params["bk"][0]
    v = hidden @ params["wv"] + params["bv"][0]
    def heads(t):  # (B,S,H) -> (B,NH,S,hd)
        return t.reshape(B, S, num_heads, hd).transpose(0, 2, 1, 3)
    q, k, v = heads(q), heads(k), heads(v)
    scores = jnp.einsum("bnqd,bnkd->bnqk", q, k) / math.sqrt(hd)
    scores = scores + attention_mask            # (B,1,1,S) broadcast
    probs = jax.nn.softmax(scores, axis=-1)
    ctx = jnp.einsum("bnqk,bnkd->bnqd", probs, v)
    ctx = ctx.transpose(0, 2, 1, 3).reshape(B, S, H)
    o = ctx @ params["wo"] + params["bo"][0]
    y = o + hidden
    mean = jnp.mean(y, axis=-1, keepdims=True)
    var = jnp.mean((y - mean) ** 2, axis=-1, keepdims=True)
    yn = (y - mean) * jax.lax.rsqrt(var + eps)
    return yn * params["ln_gamma"][0] + params["ln_beta"][0], probs


if __name__ == "__main__":
    B, S, H, NH = 2, 8, 32, 4   # hidden_size=32, num_attention_heads=4

    key = jax.random.PRNGKey(0)
    ks = jax.random.split(key, 12)
    scale = 0.02
    params = {
        "wq": scale * jax.random.normal(ks[0], (H, H), jnp.float32),
        "bq": scale * jax.random.normal(ks[1], (1, H), jnp.float32),
        "wk": scale * jax.random.normal(ks[2], (H, H), jnp.float32),
        "bk": scale * jax.random.normal(ks[3], (1, H), jnp.float32),
        "wv": scale * jax.random.normal(ks[4], (H, H), jnp.float32),
        "bv": scale * jax.random.normal(ks[5], (1, H), jnp.float32),
        "wo": scale * jax.random.normal(ks[6], (H, H), jnp.float32),
        "bo": scale * jax.random.normal(ks[7], (1, H), jnp.float32),
        "ln_gamma": jnp.ones((1, H), jnp.float32),
        "ln_beta": jnp.zeros((1, H), jnp.float32),
    }

    hidden = jax.random.normal(ks[8], (B, S, H), jnp.float32)
    # Standard BERT additive mask: 0 for attended positions, -10000 for padding.
    pad = (jnp.arange(S) >= S - 2).astype(jnp.float32)          # last 2 positions padded
    attention_mask = (pad * -10000.0).reshape(1, 1, 1, S)
    attention_mask = jnp.broadcast_to(attention_mask, (B, 1, 1, S))

    # Host-side weight fusion hoisted out of the forward call (done once).
    fused = prepare_params(params, num_heads=NH)

    # Variant 1: with attention_probs output (matches the PyTorch module signature).
    out, probs = bert_attention(hidden, attention_mask, fused, num_heads=NH)
    jax.block_until_ready((out, probs))

    out_r, probs_r = bert_attention_ref(hidden, attention_mask, params, num_heads=NH)
    # bf16 matmul operands / bf16 probs output -> loosened (but still tight) tolerances.
    assert jnp.allclose(out, out_r, atol=3e-2, rtol=3e-2)
    assert jnp.allclose(probs.astype(jnp.float32), probs_r, atol=1e-2, rtol=1e-2)

    # Variant 2: no attention_probs HBM writeback (fast path).
    out2, _ = bert_attention(hidden, attention_mask, fused, num_heads=NH,
                             output_attentions=False)
    jax.block_until_ready(out2)
    assert jnp.allclose(out2, out_r, atol=3e-2, rtol=3e-2)

    print("KERNEL_OK")
</pallas_src>

<mosaic_0001>
module attributes {stable_mosaic.version = 11 : i64} {
  func.func @bert_attention_kernel(%arg0: i32, %arg1: i32, %arg2: memref<1x8x32xf32, #tpu.memory_space<vmem>>, %arg3: memref<1x1x8xf32, #tpu.memory_space<vmem>>, %arg4: memref<32x96xbf16, #tpu.memory_space<vmem>>, %arg5: memref<1x96xf32, #tpu.memory_space<vmem>>, %arg6: memref<32x32xbf16, #tpu.memory_space<vmem>>, %arg7: memref<1x32xf32, #tpu.memory_space<vmem>>, %arg8: memref<1x32xf32, #tpu.memory_space<vmem>>, %arg9: memref<1x32xf32, #tpu.memory_space<vmem>>, %arg10: memref<1x8x32xf32, #tpu.memory_space<vmem>>, %arg11: memref<1x4x8x8xbf16, #tpu.memory_space<vmem>>, %arg12: memref<4x8x8xbf16, #tpu.memory_space<vmem>>, %arg13: memref<4x8x8xbf16, #tpu.memory_space<vmem>>, %arg14: memref<4x8x8xbf16, #tpu.memory_space<vmem>>, %arg15: memref<8x32xbf16, #tpu.memory_space<vmem>>) attributes {dimension_semantics = [#tpu.dimension_semantics<parallel>, #tpu.dimension_semantics<arbitrary>], iteration_bounds = array<i64: 2, 1>, scalar_prefetch = 0 : i64, scratch_operands = 4 : i64, tpu.core_type = #tpu.core_type<tc>, window_params = [{transform_indices = @transform_0, window_bounds = array<i64: 1, 8, 32>}, {transform_indices = @transform_1, window_bounds = array<i64: 1, 1, 8>}, {pipeline_mode = #tpu.pipeline_mode<synchronous>, transform_indices = @transform_2, window_bounds = array<i64: 32, 96>}, {pipeline_mode = #tpu.pipeline_mode<synchronous>, transform_indices = @transform_3, window_bounds = array<i64: 1, 96>}, {pipeline_mode = #tpu.pipeline_mode<synchronous>, transform_indices = @transform_4, window_bounds = array<i64: 32, 32>}, {pipeline_mode = #tpu.pipeline_mode<synchronous>, transform_indices = @transform_5, window_bounds = array<i64: 1, 32>}, {pipeline_mode = #tpu.pipeline_mode<synchronous>, transform_indices = @transform_6, window_bounds = array<i64: 1, 32>}, {pipeline_mode = #tpu.pipeline_mode<synchronous>, transform_indices = @transform_7, window_bounds = array<i64: 1, 32>}, {transform_indices = @transform_8, window_bounds = array<i64: 1, 8, 32>}, {transform_indices = @transform_9, window_bounds = array<i64: 1, 4, 8, 8>}]} {
    %c0_i32 = arith.constant 0 : i32
    %0 = arith.cmpi eq, %arg1, %c0_i32 : i32
    %1 = arith.extui %0 : i1 to i32
    %c0_i32_0 = arith.constant 0 : i32
    %2 = arith.cmpi ne, %1, %c0_i32_0 : i32
    scf.if %2 {
      %c0_44 = arith.constant 0 : index
      %c0_45 = arith.constant 0 : index
      %c0_46 = arith.constant 0 : index
      %84 = vector.load %arg2[%c0_44, %c0_45, %c0_46] : memref<1x8x32xf32, #tpu.memory_space<vmem>>, vector<1x8x32xf32>
      %85 = vector.shape_cast %84 : vector<1x8x32xf32> to vector<8x32xf32>
      %86 = arith.truncf %85 : vector<8x32xf32> to vector<8x32xbf16>
      %c0_47 = arith.constant 0 : index
      %c0_48 = arith.constant 0 : index
      %87 = vector.load %arg4[%c0_47, %c0_48] : memref<32x96xbf16, #tpu.memory_space<vmem>>, vector<32x96xbf16>
      %cst_49 = arith.constant dense<0.000000e+00> : vector<8x96xf32>
      %88 = tpu.matmul %86, %87, %cst_49 {dimension_numbers = #tpu.dot_dimension_numbers<[1], [0], [0], [1], [0, 0, 1, 1], [], []>} : vector<8x32xbf16>, vector<32x96xbf16>, vector<8x96xf32> -> vector<8x96xf32>
      %c0_50 = arith.constant 0 : index
      %c0_51 = arith.constant 0 : index
      %89 = vector.load %arg5[%c0_50, %c0_51] : memref<1x96xf32, #tpu.memory_space<vmem>>, vector<1x96xf32>
      %90 = vector.broadcast %89 : vector<1x96xf32> to vector<8x96xf32>
      %91 = arith.addf %88, %90 : vector<8x96xf32>
      %92 = arith.truncf %91 : vector<8x96xf32> to vector<8x96xbf16>
      %93 = vector.extract_strided_slice %92 {offsets = [0, 0], sizes = [8, 8], strides = [1, 1]} : vector<8x96xbf16> to vector<8x8xbf16>
      %c0_52 = arith.constant 0 : index
      %c0_53 = arith.constant 0 : index
      %c0_54 = arith.constant 0 : index
      %94 = vector.load %arg12[%c0_52, %c0_53, %c0_54] : memref<4x8x8xbf16, #tpu.memory_space<vmem>>, vector<1x8x8xbf16>
      %95 = vector.shape_cast %94 : vector<1x8x8xbf16> to vector<8x8xbf16>
      %96 = vector.shape_cast %93 : vector<8x8xbf16> to vector<1x8x8xbf16>
      tpu.vector_store %arg12[%c0_52, %c0_53, %c0_54], %96 {strides = array<i32>} : memref<4x8x8xbf16, #tpu.memory_space<vmem>>, vector<1x8x8xbf16>,
      %97 = vector.extract_strided_slice %92 {offsets = [0, 32], sizes = [8, 8], strides = [1, 1]} : vector<8x96xbf16> to vector<8x8xbf16>
      %c0_55 = arith.constant 0 : index
      %c0_56 = arith.constant 0 : index
      %c0_57 = arith.constant 0 : index
      %98 = vector.load %arg13[%c0_55, %c0_56, %c0_57] : memref<4x8x8xbf16, #tpu.memory_space<vmem>>, vector<1x8x8xbf16>
      %99 = vector.shape_cast %98 : vector<1x8x8xbf16> to vector<8x8xbf16>
      %100 = vector.shape_cast %97 : vector<8x8xbf16> to vector<1x8x8xbf16>
      tpu.vector_store %arg13[%c0_55, %c0_56, %c0_57], %100 {strides = array<i32>} : memref<4x8x8xbf16, #tpu.memory_space<vmem>>, vector<1x8x8xbf16>,
      %101 = vector.extract_strided_slice %92 {offsets = [0, 64], sizes = [8, 8], strides = [1, 1]} : vector<8x96xbf16> to vector<8x8xbf16>
      %c0_58 = arith.constant 0 : index
      %c0_59 = arith.constant 0 : index
      %c0_60 = arith.constant 0 : index
      %102 = vector.load %arg14[%c0_58, %c0_59, %c0_60] : memref<4x8x8xbf16, #tpu.memory_space<vmem>>, vector<1x8x8xbf16>
      %103 = vector.shape_cast %102 : vector<1x8x8xbf16> to vector<8x8xbf16>
      %104 = vector.shape_cast %101 : vector<8x8xbf16> to vector<1x8x8xbf16>
      tpu.vector_store %arg14[%c0_58, %c0_59, %c0_60], %104 {strides = array<i32>} : memref<4x8x8xbf16, #tpu.memory_space<vmem>>, vector<1x8x8xbf16>,
      %105 = vector.extract_strided_slice %92 {offsets = [0, 8], sizes = [8, 8], strides = [1, 1]} : vector<8x96xbf16> to vector<8x8xbf16>
      %c1 = arith.constant 1 : index
      %c0_61 = arith.constant 0 : index
      %c0_62 = arith.constant 0 : index
      %106 = vector.load %arg12[%c1, %c0_61, %c0_62] : memref<4x8x8xbf16, #tpu.memory_space<vmem>>, vector<1x8x8xbf16>
      %107 = vector.shape_cast %106 : vector<1x8x8xbf16> to vector<8x8xbf16>
      %108 = vector.shape_cast %105 : vector<8x8xbf16> to vector<1x8x8xbf16>
      tpu.vector_store %arg12[%c1, %c0_61, %c0_62], %108 {strides = array<i32>} : memref<4x8x8xbf16, #tpu.memory_space<vmem>>, vector<1x8x8xbf16>,
      %109 = vector.extract_strided_slice %92 {offsets = [0, 40], sizes = [8, 8], strides = [1, 1]} : vector<8x96xbf16> to vector<8x8xbf16>
      %c1_63 = arith.constant 1 : index
      %c0_64 = arith.constant 0 : index
      %c0_65 = arith.constant 0 : index
      %110 = vector.load %arg13[%c1_63, %c0_64, %c0_65] : memref<4x8x8xbf16, #tpu.memory_space<vmem>>, vector<1x8x8xbf16>
      %111 = vector.shape_cast %110 : vector<1x8x8xbf16> to vector<8x8xbf16>
      %112 = vector.shape_cast %109 : vector<8x8xbf16> to vector<1x8x8xbf16>
      tpu.vector_store %arg13[%c1_63, %c0_64, %c0_65], %112 {strides = array<i32>} : memref<4x8x8xbf16, #tpu.memory_space<vmem>>, vector<1x8x8xbf16>,
      %113 = vector.extract_strided_slice %92 {offsets = [0, 72], sizes = [8, 8], strides = [1, 1]} : vector<8x96xbf16> to vector<8x8xbf16>
      %c1_66 = arith.constant 1 : index
      %c0_67 = arith.constant 0 : index
      %c0_68 = arith.constant 0 : index
      %114 = vector.load %arg14[%c1_66, %c0_67, %c0_68] : memref<4x8x8xbf16, #tpu.memory_space<vmem>>, vector<1x8x8xbf16>
      %115 = vector.shape_cast %114 : vector<1x8x8xbf16> to vector<8x8xbf16>
      %116 = vector.shape_cast %113 : vector<8x8xbf16> to vector<1x8x8xbf16>
      tpu.vector_store %arg14[%c1_66, %c0_67, %c0_68], %116 {strides = array<i32>} : memref<4x8x8xbf16, #tpu.memory_space<vmem>>, vector<1x8x8xbf16>,
      %117 = vector.extract_strided_slice %92 {offsets = [0, 16], sizes = [8, 8], strides = [1, 1]} : vector<8x96xbf16> to vector<8x8xbf16>
      %c2 = arith.constant 2 : index
      %c0_69 = arith.constant 0 : index
      %c0_70 = arith.constant 0 : index
      %118 = vector.load %arg12[%c2, %c0_69, %c0_70] : memref<4x8x8xbf16, #tpu.memory_space<vmem>>, vector<1x8x8xbf16>
      %119 = vector.shape_cast %118 : vector<1x8x8xbf16> to vector<8x8xbf16>
      %120 = vector.shape_cast %117 : vector<8x8xbf16> to vector<1x8x8xbf16>
      tpu.vector_store %arg12[%c2, %c0_69, %c0_70], %120 {strides = array<i32>} : memref<4x8x8xbf16, #tpu.memory_space<vmem>>, vector<1x8x8xbf16>,
      %121 = vector.extract_strided_slice %92 {offsets = [0, 48], sizes = [8, 8], strides = [1, 1]} : vector<8x96xbf16> to vector<8x8xbf16>
      %c2_71 = arith.constant 2 : index
      %c0_72 = arith.constant 0 : index
      %c0_73 = arith.constant 0 : index
      %122 = vector.load %arg13[%c2_71, %c0_72, %c0_73] : memref<4x8x8xbf16, #tpu.memory_space<vmem>>, vector<1x8x8xbf16>
      %123 = vector.shape_cast %122 : vector<1x8x8xbf16> to vector<8x8xbf16>
      %124 = vector.shape_cast %121 : vector<8x8xbf16> to vector<1x8x8xbf16>
      tpu.vector_store %arg13[%c2_71, %c0_72, %c0_73], %124 {strides = array<i32>} : memref<4x8x8xbf16, #tpu.memory_space<vmem>>, vector<1x8x8xbf16>,
      %125 = vector.extract_strided_slice %92 {offsets = [0, 80], sizes = [8, 8], strides = [1, 1]} : vector<8x96xbf16> to vector<8x8xbf16>
      %c2_74 = arith.constant 2 : index
      %c0_75 = arith.constant 0 : index
      %c0_76 = arith.constant 0 : index
      %126 = vector.load %arg14[%c2_74, %c0_75, %c0_76] : memref<4x8x8xbf16, #tpu.memory_space<vmem>>, vector<1x8x8xbf16>
      %127 = vector.shape_cast %126 : vector<1x8x8xbf16> to vector<8x8xbf16>
      %128 = vector.shape_cast %125 : vector<8x8xbf16> to vector<1x8x8xbf16>
      tpu.vector_store %arg14[%c2_74, %c0_75, %c0_76], %128 {strides = array<i32>} : memref<4x8x8xbf16, #tpu.memory_space<vmem>>, vector<1x8x8xbf16>,
      %129 = vector.extract_strided_slice %92 {offsets = [0, 24], sizes = [8, 8], strides = [1, 1]} : vector<8x96xbf16> to vector<8x8xbf16>
      %c3 = arith.constant 3 : index
      %c0_77 = arith.constant 0 : index
      %c0_78 = arith.constant 0 : index
      %130 = vector.load %arg12[%c3, %c0_77, %c0_78] : memref<4x8x8xbf16, #tpu.memory_space<vmem>>, vector<1x8x8xbf16>
      %131 = vector.shape_cast %130 : vector<1x8x8xbf16> to vector<8x8xbf16>
      %132 = vector.shape_cast %129 : vector<8x8xbf16> to vector<1x8x8xbf16>
      tpu.vector_store %arg12[%c3, %c0_77, %c0_78], %132 {strides = array<i32>} : memref<4x8x8xbf16, #tpu.memory_space<vmem>>, vector<1x8x8xbf16>,
      %133 = vector.extract_strided_slice %92 {offsets = [0, 56], sizes = [8, 8], strides = [1, 1]} : vector<8x96xbf16> to vector<8x8xbf16>
      %c3_79 = arith.constant 3 : index
      %c0_80 = arith.constant 0 : index
      %c0_81 = arith.constant 0 : index
      %134 = vector.load %arg13[%c3_79, %c0_80, %c0_81] : memref<4x8x8xbf16, #tpu.memory_space<vmem>>, vector<1x8x8xbf16>
      %135 = vector.shape_cast %134 : vector<1x8x8xbf16> to vector<8x8xbf16>
      %136 = vector.shape_cast %133 : vector<8x8xbf16> to vector<1x8x8xbf16>
      tpu.vector_store %arg13[%c3_79, %c0_80, %c0_81], %136 {strides = array<i32>} : memref<4x8x8xbf16, #tpu.memory_space<vmem>>, vector<1x8x8xbf16>,
      %137 = vector.extract_strided_slice %92 {offsets = [0, 88], sizes = [8, 8], strides = [1, 1]} : vector<8x96xbf16> to vector<8x8xbf16>
      %c3_82 = arith.constant 3 : index
      %c0_83 = arith.constant 0 : index
      %c0_84 = arith.constant 0 : index
      %138 = vector.load %arg14[%c3_82, %c0_83, %c0_84] : memref<4x8x8xbf16, #tpu.memory_space<vmem>>, vector<1x8x8xbf16>
      %139 = vector.shape_cast %138 : vector<1x8x8xbf16> to vector<8x8xbf16>
      %140 = vector.shape_cast %137 : vector<8x8xbf16> to vector<1x8x8xbf16>
      tpu.vector_store %arg14[%c3_82, %c0_83, %c0_84], %140 {strides = array<i32>} : memref<4x8x8xbf16, #tpu.memory_space<vmem>>, vector<1x8x8xbf16>,
    } else {
    }
    %c8_i32 = arith.constant 8 : i32
    %3 = arith.muli %arg1, %c8_i32 : i32
    %4 = tpu.assume_multiple %3, 8 : i32
    %c0 = arith.constant 0 : index
    %5 = arith.index_cast %4 : i32 to index
    %c0_1 = arith.constant 0 : index
    %6 = vector.load %arg2[%c0, %5, %c0_1] : memref<1x8x32xf32, #tpu.memory_space<vmem>>, vector<1x8x32xf32>
    %7 = vector.shape_cast %6 : vector<1x8x32xf32> to vector<8x32xf32>
    %c0_2 = arith.constant 0 : index
    %c0_3 = arith.constant 0 : index
    %c0_4 = arith.constant 0 : index
    %8 = vector.load %arg3[%c0_2, %c0_3, %c0_4] : memref<1x1x8xf32, #tpu.memory_space<vmem>>, vector<1x1x8xf32>
    %9 = vector.shape_cast %8 : vector<1x1x8xf32> to vector<1x8xf32>
    %c0_5 = arith.constant 0 : index
    %10 = arith.index_cast %4 : i32 to index
    %c0_6 = arith.constant 0 : index
    %11 = vector.load %arg12[%c0_5, %10, %c0_6] : memref<4x8x8xbf16, #tpu.memory_space<vmem>>, vector<4x8x8xbf16>
    %c0_7 = arith.constant 0 : index
    %c0_8 = arith.constant 0 : index
    %c0_9 = arith.constant 0 : index
    %12 = vector.load %arg13[%c0_7, %c0_8, %c0_9] : memref<4x8x8xbf16, #tpu.memory_space<vmem>>, vector<4x8x8xbf16>
    %c0_10 = arith.constant 0 : index
    %c0_11 = arith.constant 0 : index
    %c0_12 = arith.constant 0 : index
    %13 = vector.load %arg14[%c0_10, %c0_11, %c0_12] : memref<4x8x8xbf16, #tpu.memory_space<vmem>>, vector<4x8x8xbf16>
    "tpu.trace_start"() <{level = 10 : i32, message = "hqd,hkd->hqk"}> : () -> ()
    %cst = arith.constant dense<0.000000e+00> : vector<4x8x8xf32>
    %14 = tpu.matmul %11, %12, %cst {dimension_numbers = #tpu.dot_dimension_numbers<[2], [2], [1], [1], [0, 0, 0, 1, 1, 1], [0], [0]>} : vector<4x8x8xbf16>, vector<4x8x8xbf16>, vector<4x8x8xf32> -> vector<4x8x8xf32>
    "tpu.trace_stop"() : () -> ()
    %15 = vector.shape_cast %9 : vector<1x8xf32> to vector<1x1x8xf32>
    %16 = vector.broadcast %15 : vector<1x1x8xf32> to vector<4x8x8xf32>
    %17 = arith.addf %14, %16 : vector<4x8x8xf32>
    %cst_13 = arith.constant dense<0xFF800000> : vector<4x8xf32>
    %18 = vector.multi_reduction <maximumf>, %17, %cst_13 [2] : vector<4x8x8xf32> to vector<4x8xf32>
    %19 = vector.shape_cast %18 : vector<4x8xf32> to vector<4x8x1xf32>
    %20 = vector.broadcast %19 : vector<4x8x1xf32> to vector<4x8x8xf32>
    %21 = arith.subf %17, %20 : vector<4x8x8xf32>
    %22 = math.exp %21 : vector<4x8x8xf32>
    %cst_14 = arith.constant dense<0.000000e+00> : vector<4x8xf32>
    %23 = vector.multi_reduction <add>, %22, %cst_14 [2] : vector<4x8x8xf32> to vector<4x8xf32>
    %24 = vector.shape_cast %23 : vector<4x8xf32> to vector<4x8x1xf32>
    %25 = tpu.reciprocal %24 : vector<4x8x1xf32> -> vector<4x8x1xf32>
    %26 = vector.broadcast %25 : vector<4x8x1xf32> to vector<4x8x8xf32>
    %27 = arith.mulf %22, %26 : vector<4x8x8xf32>
    %28 = arith.truncf %27 : vector<4x8x8xf32> to vector<4x8x8xbf16>
    %c0_15 = arith.constant 0 : index
    %c0_16 = arith.constant 0 : index
    %c0_17 = arith.constant 0 : index
    %c0_18 = arith.constant 0 : index
    %29 = vector.load %arg11[%c0_15, %c0_16, %c0_17, %c0_18] : memref<1x4x8x8xbf16, #tpu.memory_space<vmem>>, vector<1x4x8x8xbf16>
    %30 = vector.shape_cast %29 : vector<1x4x8x8xbf16> to vector<4x8x8xbf16>
    %31 = vector.shape_cast %28 : vector<4x8x8xbf16> to vector<1x4x8x8xbf16>
    tpu.vector_store %arg11[%c0_15, %c0_16, %c0_17, %c0_18], %31 {strides = array<i32>} : memref<1x4x8x8xbf16, #tpu.memory_space<vmem>>, vector<1x4x8x8xbf16>,
    %32 = arith.truncf %27 : vector<4x8x8xf32> to vector<4x8x8xbf16>
    "tpu.trace_start"() <{level = 10 : i32, message = "hqk,hkd->hqd"}> : () -> ()
    %cst_19 = arith.constant dense<0.000000e+00> : vector<4x8x8xf32>
    %33 = tpu.matmul %32, %13, %cst_19 {dimension_numbers = #tpu.dot_dimension_numbers<[2], [1], [1], [2], [0, 0, 0, 1, 1, 2], [0], [0]>} : vector<4x8x8xbf16>, vector<4x8x8xbf16>, vector<4x8x8xf32> -> vector<4x8x8xf32>
    "tpu.trace_stop"() : () -> ()
    %34 = vector.extract_strided_slice %33 {offsets = [0, 0, 0], sizes = [1, 8, 8], strides = [1, 1, 1]} : vector<4x8x8xf32> to vector<1x8x8xf32>
    %35 = vector.shape_cast %34 : vector<1x8x8xf32> to vector<8x8xf32>
    %36 = arith.truncf %35 : vector<8x8xf32> to vector<8x8xbf16>
    %c0_20 = arith.constant 0 : index
    %c0_21 = arith.constant 0 : index
    %37 = vector.load %arg15[%c0_20, %c0_21] : memref<8x32xbf16, #tpu.memory_space<vmem>>, vector<8x8xbf16>
    tpu.vector_store %arg15[%c0_20, %c0_21], %36 {strides = array<i32>} : memref<8x32xbf16, #tpu.memory_space<vmem>>, vector<8x8xbf16>,
    %38 = vector.extract_strided_slice %33 {offsets = [1, 0, 0], sizes = [1, 8, 8], strides = [1, 1, 1]} : vector<4x8x8xf32> to vector<1x8x8xf32>
    %39 = vector.shape_cast %38 : vector<1x8x8xf32> to vector<8x8xf32>
    %40 = arith.truncf %39 : vector<8x8xf32> to vector<8x8xbf16>
    %c0_22 = arith.constant 0 : index
    %c8 = arith.constant 8 : index
    %41 = vector.load %arg15[%c0_22, %c8] : memref<8x32xbf16, #tpu.memory_space<vmem>>, vector<8x8xbf16>
    tpu.vector_store %arg15[%c0_22, %c8], %40 {strides = array<i32>} : memref<8x32xbf16, #tpu.memory_space<vmem>>, vector<8x8xbf16>,
    %42 = vector.extract_strided_slice %33 {offsets = [2, 0, 0], sizes = [1, 8, 8], strides = [1, 1, 1]} : vector<4x8x8xf32> to vector<1x8x8xf32>
    %43 = vector.shape_cast %42 : vector<1x8x8xf32> to vector<8x8xf32>
    %44 = arith.truncf %43 : vector<8x8xf32> to vector<8x8xbf16>
    %c0_23 = arith.constant 0 : index
    %c16 = arith.constant 16 : index
    %45 = vector.load %arg15[%c0_23, %c16] : memref<8x32xbf16, #tpu.memory_space<vmem>>, vector<8x8xbf16>
    tpu.vector_store %arg15[%c0_23, %c16], %44 {strides = array<i32>} : memref<8x32xbf16, #tpu.memory_space<vmem>>, vector<8x8xbf16>,
    %46 = vector.extract_strided_slice %33 {offsets = [3, 0, 0], sizes = [1, 8, 8], strides = [1, 1, 1]} : vector<4x8x8xf32> to vector<1x8x8xf32>
    %47 = vector.shape_cast %46 : vector<1x8x8xf32> to vector<8x8xf32>
    %48 = arith.truncf %47 : vector<8x8xf32> to vector<8x8xbf16>
    %c0_24 = arith.constant 0 : index
    %c24 = arith.constant 24 : index
    %49 = vector.load %arg15[%c0_24, %c24] : memref<8x32xbf16, #tpu.memory_space<vmem>>, vector<8x8xbf16>
    tpu.vector_store %arg15[%c0_24, %c24], %48 {strides = array<i32>} : memref<8x32xbf16, #tpu.memory_space<vmem>>, vector<8x8xbf16>,
    %c0_25 = arith.constant 0 : index
    %c0_26 = arith.constant 0 : index
    %50 = vector.load %arg15[%c0_25, %c0_26] : memref<8x32xbf16, #tpu.memory_space<vmem>>, vector<8x32xbf16>
    %c0_27 = arith.constant 0 : index
    %c0_28 = arith.constant 0 : index
    %51 = vector.load %arg6[%c0_27, %c0_28] : memref<32x32xbf16, #tpu.memory_space<vmem>>, vector<32x32xbf16>
    %cst_29 = arith.constant dense<0.000000e+00> : vector<8x32xf32>
    %52 = tpu.matmul %50, %51, %cst_29 {dimension_numbers = #tpu.dot_dimension_numbers<[1], [0], [0], [1], [0, 0, 1, 1], [], []>} : vector<8x32xbf16>, vector<32x32xbf16>, vector<8x32xf32> -> vector<8x32xf32>
    %c0_30 = arith.constant 0 : index
    %c0_31 = arith.constant 0 : index
    %53 = vector.load %arg7[%c0_30, %c0_31] : memref<1x32xf32, #tpu.memory_space<vmem>>, vector<1x32xf32>
    %54 = vector.broadcast %53 : vector<1x32xf32> to vector<8x32xf32>
    %55 = arith.addf %52, %54 : vector<8x32xf32>
    %56 = arith.addf %55, %7 : vector<8x32xf32>
    %cst_32 = arith.constant dense<0.000000e+00> : vector<8xf32>
    %57 = vector.multi_reduction <add>, %56, %cst_32 [1] : vector<8x32xf32> to vector<8xf32>
    %58 = vector.shape_cast %57 : vector<8xf32> to vector<8x1xf32>
    %cst_33 = arith.constant 3.200000e+01 : f32
    %59 = vector.broadcast %cst_33 : f32 to vector<8x1xf32>
    %60 = arith.divf %58, %59 : vector<8x1xf32>
    %61 = vector.broadcast %60 : vector<8x1xf32> to vector<8x32xf32>
    %62 = arith.subf %56, %61 : vector<8x32xf32>
    %63 = arith.mulf %62, %62 : vector<8x32xf32>
    %cst_34 = arith.constant dense<0.000000e+00> : vector<8xf32>
    %64 = vector.multi_reduction <add>, %63, %cst_34 [1] : vector<8x32xf32> to vector<8xf32>
    %65 = vector.shape_cast %64 : vector<8xf32> to vector<8x1xf32>
    %cst_35 = arith.constant 3.200000e+01 : f32
    %66 = vector.broadcast %cst_35 : f32 to vector<8x1xf32>
    %67 = arith.divf %65, %66 : vector<8x1xf32>
    %68 = vector.broadcast %60 : vector<8x1xf32> to vector<8x32xf32>
    %69 = arith.subf %56, %68 : vector<8x32xf32>
    %cst_36 = arith.constant 9.99999996E-13 : f32
    %70 = vector.broadcast %cst_36 : f32 to vector<8x1xf32>
    %71 = arith.addf %67, %70 : vector<8x1xf32>
    %72 = math.rsqrt %71 : vector<8x1xf32>
    %73 = vector.broadcast %72 : vector<8x1xf32> to vector<8x32xf32>
    %74 = arith.mulf %69, %73 : vector<8x32xf32>
    %c0_37 = arith.constant 0 : index
    %c0_38 = arith.constant 0 : index
    %75 = vector.load %arg8[%c0_37, %c0_38] : memref<1x32xf32, #tpu.memory_space<vmem>>, vector<1x32xf32>
    %76 = vector.broadcast %75 : vector<1x32xf32> to vector<8x32xf32>
    %77 = arith.mulf %74, %76 : vector<8x32xf32>
    %c0_39 = arith.constant 0 : index
    %c0_40 = arith.constant 0 : index
    %78 = vector.load %arg9[%c0_39, %c0_40] : memref<1x32xf32, #tpu.memory_space<vmem>>, vector<1x32xf32>
    %79 = vector.broadcast %78 : vector<1x32xf32> to vector<8x32xf32>
    %80 = arith.addf %77, %79 : vector<8x32xf32>
    %c0_41 = arith.constant 0 : index
    %c0_42 = arith.constant 0 : index
    %c0_43 = arith.constant 0 : index
    %81 = vector.load %arg10[%c0_41, %c0_42, %c0_43] : memref<1x8x32xf32, #tpu.memory_space<vmem>>, vector<1x8x32xf32>
    %82 = vector.shape_cast %81 : vector<1x8x32xf32> to vector<8x32xf32>
    %83 = vector.shape_cast %80 : vector<8x32xf32> to vector<1x8x32xf32>
    tpu.vector_store %arg10[%c0_41, %c0_42, %c0_43], %83 {strides = array<i32>} : memref<1x8x32xf32, #tpu.memory_space<vmem>>, vector<1x8x32xf32>,
    return
  }
  func.func @transform_0(%arg0: i32, %arg1: i32) -> (i32, i32, i32) {
    %c0_i32 = arith.constant 0 : i32
    %c0_i32_0 = arith.constant 0 : i32
    %c0_i32_1 = arith.constant 0 : i32
    return %arg0, %c0_i32, %c0_i32_0 : i32, i32, i32
  }
  func.func @transform_1(%arg0: i32, %arg1: i32) -> (i32, i32, i32) {
    %c0_i32 = arith.constant 0 : i32
    %c0_i32_0 = arith.constant 0 : i32
    %c0_i32_1 = arith.constant 0 : i32
    return %arg0, %c0_i32, %c0_i32_0 : i32, i32, i32
  }
  func.func @transform_2(%arg0: i32, %arg1: i32) -> (i32, i32) {
    %c0_i32 = arith.constant 0 : i32
    %c0_i32_0 = arith.constant 0 : i32
    %c0_i32_1 = arith.constant 0 : i32
    return %c0_i32, %c0_i32_0 : i32, i32
  }
  func.func @transform_3(%arg0: i32, %arg1: i32) -> (i32, i32) {
    %c0_i32 = arith.constant 0 : i32
    %c0_i32_0 = arith.constant 0 : i32
    %c0_i32_1 = arith.constant 0 : i32
    return %c0_i32, %c0_i32_0 : i32, i32
  }
  func.func @transform_4(%arg0: i32, %arg1: i32) -> (i32, i32) {
    %c0_i32 = arith.constant 0 : i32
    %c0_i32_0 = arith.constant 0 : i32
    %c0_i32_1 = arith.constant 0 : i32
    return %c0_i32, %c0_i32_0 : i32, i32
  }
  func.func @transform_5(%arg0: i32, %arg1: i32) -> (i32, i32) {
    %c0_i32 = arith.constant 0 : i32
    %c0_i32_0 = arith.constant 0 : i32
    %c0_i32_1 = arith.constant 0 : i32
    return %c0_i32, %c0_i32_0 : i32, i32
  }
  func.func @transform_6(%arg0: i32, %arg1: i32) -> (i32, i32) {
    %c0_i32 = arith.constant 0 : i32
    %c0_i32_0 = arith.constant 0 : i32
    %c0_i32_1 = arith.constant 0 : i32
    return %c0_i32, %c0_i32_0 : i32, i32
  }
  func.func @transform_7(%arg0: i32, %arg1: i32) -> (i32, i32) {
    %c0_i32 = arith.constant 0 : i32
    %c0_i32_0 = arith.constant 0 : i32
    %c0_i32_1 = arith.constant 0 : i32
    return %c0_i32, %c0_i32_0 : i32, i32
  }
  func.func @transform_8(%arg0: i32, %arg1: i32) -> (i32, i32, i32) {
    %c0_i32 = arith.constant 0 : i32
    %c0_i32_0 = arith.constant 0 : i32
    return %arg0, %arg1, %c0_i32 : i32, i32, i32
  }
  func.func @transform_9(%arg0: i32, %arg1: i32) -> (i32, i32, i32, i32) {
    %c0_i32 = arith.constant 0 : i32
    %c0_i32_0 = arith.constant 0 : i32
    %c0_i32_1 = arith.constant 0 : i32
    return %arg0, %c0_i32, %arg1, %c0_i32_0 : i32, i32, i32, i32
  }
}

</mosaic_0001>

<bundles_post_ra>
// kernel: tpu_custom_call.1
= control target key start
LH: loop header
LB: loop body
LE: loop exit
PB: predicated region body
PF: predicated region fallthrough
CT: control target
= control target key end

     0   :  { %s2274_s0 = inlined_call_operand.hbm [shape: f32[2,8,32], index: 0, kind: input, shape index: {}]   ;;  %s2275_s1 = inlined_call_operand.hbm [shape: f32[2,1,8], index: 1, kind: input, shape index: {}]   ;;  %s2276_s2 = inlined_call_operand.hbm [shape: bf16[32,96], index: 2, kind: input, shape index: {}]   ;;  %s2277_s3 = inlined_call_operand.vmem [shape: f32[1,96], index: 3, kind: input, shape index: {}]   ;;  %s2278_s4 = inlined_call_operand.hbm [shape: bf16[32,32], index: 4, kind: input, shape index: {}]   ;;  %s2279_s5 = inlined_call_operand.vmem [shape: f32[1,32], index: 5, kind: input, shape index: {}]   ;;  %s2280_s6 = inlined_call_operand.vmem [shape: f32[1,32], index: 6, kind: input, shape index: {}]   ;;  %s2281_s7 = inlined_call_operand.vmem [shape: f32[1,32], index: 7, kind: input, shape index: {}]   ;;  %s2282_s8 = inlined_call_operand.hbm [shape: f32[2,8,32], index: 8, kind: output, shape index: {0}]   ;;  %s2283_s9 = inlined_call_operand.hbm [shape: bf16[2,4,8,8], index: 9, kind: output, shape index: {1}]  }
   0x1   :  { %2291 = sst [smem:[#allocation29_spill]] %s2274_s0 }
   0x2   :  { %2292 = sst [smem:[#allocation30_spill]] %s2276_s2 }
   0x3   :  { %2293 = sst [smem:[#allocation31_spill]] %s2278_s4 }
   0x4   :  { %15 = vsyncpa [#allocation7], 0 }
   0x5   :  { %17 = vsyncpa [#allocation7 + $0x1], 0 }
   0x6   :  { %18 = vsyncpa [#allocation10], 0 }
   0x7   :  { %20 = vsyncpa [#allocation10 + $0x1], 0 }
   0x8   :  { %21 = vsyncpa [#allocation13], 0 }
   0x9   :  { %22 = vsyncpa [#allocation8], 0 }
   0xa   :  { %24 = vsyncpa [#allocation8 + $0x1], 0 }
   0xb   :  { %25 = vsyncpa [#allocation16], 0 }
   0xc   :  { %27 = vsyncpa [#allocation16 + $0x1], 0  ;;  %s1919_s30 = smov 0   ;;  %s1921_s10 = smov 0  }
   0xd   :  { %s1923_s11 = smov 0   ;;  %s1925_s12 = smov 0  }
   0xe   :  { %s1927_s13 = smov 0   ;;  %s1929_s14 = smov 0  }
   0xf LB: > { %2294 = sst [smem:[#allocation23_spill]] %s1822_s30  ;;  %s1950_s15 = sadd.s32 4294967295, %s1842_s14   ;;  %s1842_s14 = sphi %s1929_s14, %s33_s14   ;;  %s1838_s13 = sphi %s1927_s13, %s2325_s13   ;;  %s1834_s12 = sphi %s1925_s12, %s2324_s12   ;;  %s1830_s11 = sphi %s1923_s11, %s2320_s11   ;;  %s1826_s10 = sphi %s1921_s10, %s2323_s10   ;;  %s1822_s30 = sphi %s1919_s30, %s2322_s30  }
  0x10   : > { %2295 = sst [smem:[#allocation24_spill]] %s1830_s11  ;;  %s1343_s16 = sadd.s32 4294967294, %s1842_s14  }
  0x11   : > { %2296 = sst [smem:[#allocation25_spill]] %s1842_s14  ;;  %p65_p0 = scmp.ne.s32.totalorder %s1826_s10, %s1822_s30 }
  0x12   : > { %p2284_p1 = scmp.eq.s32.totalorder %s1950_s15, 0  ;;  %p249_p3 = scmp.eq.s32.totalorder %s1343_s16, 1 }
  0x13   : > { %p1344_p5 = scmp.ge.s32.totalorder %s1842_s14, 1  ;;  %p284_p7 = scmp.lt.s32.totalorder %s1842_s14, 3 }
  0x14   : > { %p1959_p4 = por %p2284_p1, %p65_p0  ;;  %p1964_p6 = por %p249_p3, %p65_p0 }
  0x15   : > { %p1969_p8 = pnand %p1344_p5, %p284_p7  ;;  %s1844_s20 = smov [#allocation11]  }
  0x16   : > { %s2298_s18 = scalar_select %p1964_p6, 1, 0 }
  0x17   : > { %s296_s21 = sshll.u32 %s1844_s20, 4  ;;  %p1494_p9 = pneg %p1969_p8  ;;  %s297_s21 = int_to_ptr.vmem [resolvable:$true] %s296_s21 }
  0x18   : > { %2299 = sst [smem:[#allocation26_spill]] %s2298_s18  ;;  %s1845_s23 = smov [#allocation12]  }
  0x19   : > { %p1978_p11 = pnand %p1494_p9, %p2284_p1  ;;  %s312_s24 = sshll.u32 %s1845_s23, 4  ;;  %s313_s24 = int_to_ptr.vmem [resolvable:$true] %s312_s24 }
  0x1a   : > { %s1623_s25 = scalar_lea.vmem %s297_s21, 256  ;;  %p1631_p5 = scmp.lt.s32.totalorder %s297_s21, %s297_s21 }
  0x1b   : > { %p1614_p12 = pneg %p1978_p11  ;;  %p1624_p13 = scmp.ne.s32.totalorder %s297_s21, %s1623_s25 }
  0x1c   : > { %p1632_p7 = scmp.lt.s32.totalorder %s1623_s25, %s1623_s25 }
  0x1d   : > { %p1626_p0 = pnand %p1624_p13, %p1614_p12 }
  0x1e   : > { %p1633_p10 = por %p1632_p7, %p1631_p5 }
  0x1f   : > { %p1627_p3 = pneg %p1626_p0 }
  0x21   : > { %p1634_p9 = pnand %p1633_p10, %p1627_p3 }
  0x23   : > { %1637 = shalt.err (!%p1634_p9)
}
  0x24   : > { %s1846_s26 = smov 64   ;;  %s1847_s27 = smov 4  }
  0x25   : > { %s2302_s2 = sld [smem:[#allocation30_spill]]  ;;  %s1649_s16 = scalar_lea.vmem %s313_s24, 256 }
  0x26   : > { %p1650_p1 = scmp.ne.s32.totalorder %s313_s24, %s1649_s16  ;;  %p1657_p2 = scmp.lt.s32.totalorder %s313_s24, %s313_s24 }
  0x27   : > { %p1658_p6 = scmp.lt.s32.totalorder %s1649_s16, %s1649_s16 }
  0x28   : > { %p1652_p13 = pnand %p1650_p1, %p1614_p12 }
  0x29   : > { %p1659_p5 = por %p1658_p6, %p1657_p2 }
  0x2a   : > { %p1653_p0 = pneg %p1652_p13 }
  0x2b   : > { %1497 = dma.hbm_to_vmem [thread:$0]  (!%p1978_p11), %s2302_s2, 256, %s297_s21, [#allocation10], %s1846_s26, %s1846_s26, %s1847_s27  }
  0x2c   : > { %p1660_p10 = pnand %p1659_p5, %p1653_p0 }
  0x2e   : > { %1663 = shalt.err (!%p1660_p10)
}
  0x2f   : > { %s2303_s4 = sld [smem:[#allocation31_spill]]  ;;  %s45_s21 = sadd.s32 1, %s1838_s13 }
  0x30   : > { %s52_s25 = sadd.s32 1, %s1830_s11  ;;  %p47_p1 = scmp.ge.s32.totalorder %s45_s21, 2 }
  0x31   : > { %p59_p2 = scmp.ne.s32.totalorder %s1830_s11, %s1826_s10  ;;  %p60_p6 = scmp.eq.s32.totalorder %s1842_s14, 0 }
  0x32   : > { %p1517_p12 = scmp.lt.s32.totalorder %s1842_s14, 2  ;;  %s2327_s21 = smov (%p47_p1, %s45_s21), 0 }
  0x33   : > { %2304 = sst [smem:[#allocation27_spill]] %s2327_s21  ;;  %p61_p3 = por %p60_p6, %p59_p2 }
  0x34   : > { %p2305_p7 = scmp.eq.s32.totalorder %s1950_s15, 1  ;;  %s49_s28 = ssub.s32 %s1838_s13, %s2327_s21 }
  0x35   : > { %1500 = dma.hbm_to_vmem [thread:$0]  (!%p1978_p11), %s2303_s4, 256, %s313_s24, [#allocation13], %s1846_s26, %s1846_s26, %s1847_s27  }
  0x36   : > { %p2010_p9 = por %p2305_p7, %p59_p2  ;;  %s2017_s29 = sand.u32 1, %s1830_s11  }
  0x37   : > { %p50_p11 = scmp.eq.s32.totalorder %s49_s28, 0  ;;  %s1348_s24 = sshll.u32 %s2017_s29, 3 }
  0x38   : > { %s1349_s26 = sshll.u32 %s1838_s13, 7  ;;  %s2308_s0 = sld [smem:[#allocation29_spill]] }
  0x39   : > { %s2022_s27 = scalar_select %p50_p11, %s1830_s11, %s52_s25  }
  0x3a   : > { %s339_s2 = scalar_lea.vmem [#allocation6], %s1348_s24  ;;  %p2029_p13 = pnand %p1517_p12, %p61_p3 }
  0x3b   : > { %2307 = sst [smem:[#allocation28_spill]] %s2022_s27  ;;  %s346_s4 = sshll.u32 %s339_s2, 4  ;;  %s347_s4 = int_to_ptr.vmem [resolvable:$true] %s346_s4 }
  0x3c   : > { %s353_s21 = sand.u32 1, %s1842_s14   ;;  %s336_s28 = scalar_lea.sflag [#allocation7], %s2017_s29 }
  0x3d   : > { %p1666_p0 = pneg %p2029_p13  ;;  %s1677_s25 = scalar_lea.vmem %s347_s4, 128 }
  0x3e   : > { %s344_s23 = scalar_lea.hbm %s2308_s0, %s1349_s26  ;;  %p1678_p5 = scmp.ne.s32.totalorder %s347_s4, %s1677_s25 }
  0x3f   : > { %s1848_s24 = smov [#allocation6]  }
  0x40   : > { %p1680_p10 = pnand %p1678_p5, %p1666_p0  ;;  %s1682_s2 = sshll.u32 %s1848_s24, 4  ;;  %s1683_s2 = int_to_ptr.vmem [resolvable:$false] %s1682_s2 }
  0x41   : > { %s1684_s26 = scalar_lea.vmem %s1683_s2, 256  ;;  %p1685_p2 = scmp.lt.s32.totalorder %s347_s4, %s1683_s2 }
  0x42   : > { %p1681_p1 = pneg %p1680_p10  ;;  %p1686_p6 = scmp.lt.s32.totalorder %s1684_s26, %s1677_s25 }
  0x44   : > { %p1687_p12 = por %p1686_p6, %p1685_p2 }
  0x46   : > { %p1688_p3 = pnand %p1687_p12, %p1681_p1 }
  0x48   : > { %1691 = shalt.err (!%p1688_p3)
}
  0x49   : > { %1504 = dma.hbm_to_vmem [thread:$0]  (!%p2029_p13), %s344_s23, 128, %s347_s4, %s336_s28  }
  0x4a   : > { %s1350_s16 = sshll.u32 %s1838_s13, 4  ;;  %s356_s11 = scalar_lea.vmem [#allocation9], %s2017_s29 }
  0x4b   : > { %s361_s27 = scalar_lea.hbm %s2275_s1, %s1350_s16  ;;  %s363_s24 = sshll.u32 %s356_s11, 4  ;;  %s364_s24 = int_to_ptr.vmem [resolvable:$true] %s363_s24 }
  0x4c   : > { %s354_s14 = scalar_lea.sflag [#allocation10], %s353_s21  ;;  %s1705_s2 = scalar_lea.vmem %s364_s24, 16 }
  0x4d   : > { %p1706_p7 = scmp.ne.s32.totalorder %s364_s24, %s1705_s2  ;;  %s1849_s25 = smov [#allocation9]  }
  0x4e   : > { %s1710_s26 = sshll.u32 %s1849_s25, 4  ;;  %s1711_s26 = int_to_ptr.vmem [resolvable:$false] %s1710_s26 }
  0x4f   : > { %p1708_p11 = pnand %p1706_p7, %p1666_p0  ;;  %s1712_s30 = scalar_lea.vmem %s1711_s26, 32 }
  0x50   : > { %p1713_p10 = scmp.lt.s32.totalorder %s364_s24, %s1711_s26  ;;  %p1714_p1 = scmp.lt.s32.totalorder %s1712_s30, %s1705_s2 }
  0x51   : > { %p1709_p5 = pneg %p1708_p11 }
  0x52   : > { %p1715_p2 = por %p1714_p1, %p1713_p10 }
  0x54   : > { %p1716_p6 = pnand %p1715_p2, %p1709_p5 }
  0x56   : > { %1719 = shalt.err (!%p1716_p6)
}
  0x57   : > { %1507 = dma.hbm_to_vmem [thread:$0]  (!%p2029_p13), %s361_s27, 16, %s364_s24, %s354_s14  }
  0x58   : > { %372 = sbr.rel (%p1969_p8) target bundleno = 1798 (0x706), region = 52  ;;  %s2055_s0 = sand.u32 (!%p1969_p8), 1, %s1826_s10  }
  0x59   : > { %s1352_s4 = sshll.u32 (!%p1969_p8), %s2055_s0, 3  ;;  %s375_s11 = scalar_lea.sflag (!%p1969_p8), [#allocation7], %s2055_s0 }
  0x5a   : > { %s378_s30 = scalar_lea.vmem (!%p1969_p8), [#allocation6], %s1352_s4 }
  0x5d   : > { %1797 = dma.done.wait (%p1959_p4), %s375_s11, 128  }
  0x5e   : > { %1799 = vsyncadd (%p1959_p4), %s375_s11, 4294967168  ;;  %s383_s14 = sand.u32 1, %s1950_s15   ;;  %s386_s19 = scalar_lea.vmem [#allocation9], %s2055_s0 }
  0x5f   : > { %s384_s18 = scalar_lea.sflag [#allocation10], %s383_s14 }
  0x60   : > { %1801 = dma.done.wait (%p1959_p4), %s384_s18, 16  }
  0x61   : > { %1803 = vsyncadd (%p1959_p4), %s384_s18, 4294967280  ;;  %p2310_p8 = scmp.eq.s32.totalorder %s1950_s15, 0 }
  0x63   : > { %1805 = dma.done.wait (%p2310_p8), [#allocation10], 256   ;;  %p2311_p13 = pmov %p2310_p8 }
  0x64   : > { %p2312_p0 = pmov %p2310_p8 }
  0x65   : > { %1807 = vsyncadd (%p2311_p13), [#allocation10], 4294967040 }
  0x66   : > { %1809 = dma.done.wait (%p2312_p0), [#allocation13], 256   ;;  %p2313_p12 = pmov %p2312_p0 }
  0x67   : > { %v1850_v0 = vmov 0.0   ;;  %vm1851_vm0 = vmmov 0   ;;  %v1590_v1 = vld [vmem:[#allocation11 + $0x8] sm:$0xff]   ;;  %v1591_v2 = vld [vmem:[#allocation11] sm:$0xff]   ;;  %vm468_vm1 = vcmask 261120   ;;  %vm513_vm2 = vcmask 60416  }
  0x68   : > { %1811 = vsyncadd (%p2313_p12), [#allocation13], 4294967040  ;;  %1414 = vmatprep.subr.bf16.mxu0 %v1850_v0  ;;  %1418 = vmatprep.mubr.msk.bf16.mxu0 %vm1851_vm0, %v1850_v0  ;;  %v2085_v3 = vld [vmem:[%s378_s30] sm:$0xff]  ;;  %s1852_s21 = smov 80   ;;  %s1853_s29 = smov 96   ;;  %vm597_vm3 = vcmask 64512  }
  0x69   : > { %1422 = vmatprep.subr.bf16.mxu1 %v1850_v0  ;;  %1424 = vmatprep.mubr.msk.bf16.mxu1 %vm1851_vm0, %v1850_v0  ;;  %v444_v4 = vpack.c.bf16 %v2085_v3, %v2085_v3  ;;  %v1357_v5 = vld [vmem:[%s2277_s3] ss:$0 sm:$0xff]  ;;  %s1854_s27 = smov 120   ;;  %s1855_s23 = smov 88   ;;  %vm838_vm4 = vcmask 1043456   ;;  %vm1029_vm5 = vcmask 126016  }
  0x6a   : > { %1415 = vmatpush3.bf16.msra.mxu0 %v1590_v1  ;;  %s1856_s28 = smov 112   ;;  %s1857_s16 = smov 72   ;;  %v1362_v31 = vld [vmem:[%s386_s19] ss:$0 sm:$0xff]  ;;  %vm1038_vm6 = vcmask 191616   ;;  %vm1047_vm7 = vcmask 257216  }
  0x6b   : > { %1416 = vmatprep.subr.bf16.mxu0 %v1850_v0  ;;  %s1858_s20 = smov 104   ;;  %s1859_s24 = smov 56  }
  0x6c   : > { %s1860_s2 = smov 64   ;;  %s1861_s25 = smov 48  }
  0x6d   : > { %s1862_s26 = smov 40   ;;  %s1356_s11 = sshll.u32 %s2055_s0, 4 }
  0x6e   : > { %1417 = vmatpush3.bf16.msra.mxu0 %v1591_v2  ;;  %s2159_s30 = scalar_lea.vmem [#allocation15], %s1356_s11  ;;  %s1863_s14 = smov 8  }
  0x6f   : > { %1428 = vmatprep.subr.bf16.mxu0 %v1850_v0  ;;  %s1864_s18 = smov 16   ;;  %s1865_s19 = smov 24  }
  0x71   : > { %1419 = vmatmul.mubr.msk.bf16.vlgmr.msra.gmra.mxu0 %vm468_vm1, %v444_v4 }
  0x72   : > { %1430 = vmatprep.mubr.msk.bf16.mxu0 %vm1851_vm0, %v1850_v0 }
 0x131   : > { %v506_v6 = vpop.f32.mrf.mxu0 }
 0x132   : > { %v507_v7 = vadd.f32 %v1357_v5, %v506_v6 }
 0x133   : > { %v1420_v8 = vpop.f32.mrf.mxu0 }
 0x134   : > { %v2097_v9 = vpack.c.bf16 %v507_v7, %v507_v7 }
 0x135   : > { %v509_v10 = vpop.f32.mrf.mxu0 }
 0x136   : > { %546 = vrot.lane.b32.xlu1 %v2097_v9, %s1852_s21  ;;  %518 = vrot.lane.b32.xlu0 %v2097_v9, %s1853_s29  ;;  %514 = vst.msk [vmem:[#allocation2] sm:$0xf] %vm513_vm2, %v2097_v9  ;;  %s1391_s21 = sshll.u32 %s1834_s12, 8  ;;  %s1183_s29 = sshll.u32 %s2159_s30, 4  ;;  %s2198_s29 = int_to_ptr.vmem [resolvable:$true] %s1183_s29 }
 0x137   : > { %v1421_v11 = vpop.f32.mrf.mxu0 }
 0x13a   : > { %526 = vrot.lane.b32.xlu1 %v2097_v9, %s1854_s27  ;;  %531 = vrot.lane.b32.xlu0 %v2097_v9, %s1855_s23 }
 0x13d   : > { %v579_v24 = vld [vmem:[#allocation2] sm:$0xf] }
 0x13e   : > { %541 = vrot.lane.b32.xlu1 %v2097_v9, %s1856_s28  ;;  %561 = vrot.lane.b32.xlu0 %v2097_v9, %s1857_s16  ;;  %s2196_s28 = scalar_lea.hbm %s2283_s9, %s1391_s21  ;;  %s1155_s16 = scalar_lea.sflag [#allocation16], %s2055_s0 }
 0x142   : > { %556 = vrot.lane.b32.xlu0 %v2097_v9, %s1858_s20  ;;  %s1720_s20 = scalar_lea.vmem %s2198_s29, 256 }
 0x143   : > { %p1721_p4 = scmp.ne.s32.totalorder %s2198_s29, %s1720_s20 }
 0x145   : > { %p1722_p3 = pnand %p1721_p4, %p2010_p9 }
 0x147   : > { %p1723_p7 = pneg %p1722_p3 }
 0x1a8   : > { %v547_v12 = vpop.permute.xlu1 %546  ;;  %v519_v13 = vpop.permute.xlu0 %518 }
 0x1a9   : > { %550 = vst.msk [vmem:[#allocation3 + $0x8] sm:$0xf] %vm513_vm2, %v547_v12  ;;  %521 = vst.msk [vmem:[#allocation3] sm:$0xf] %vm513_vm2, %v519_v13 }
 0x1ac   : > { %v527_v14 = vpop.permute.xlu1 %526  ;;  %v532_v15 = vpop.permute.xlu0 %531 }
 0x1ad   : > { %530 = vst.msk [vmem:[#allocation2 + $0x4] sm:$0xf] %vm513_vm2, %v527_v14  ;;  %535 = vst.msk [vmem:[#allocation3 + $0x4] sm:$0xf] %vm513_vm2, %v532_v15 }
 0x1b0   : > { %v542_v16 = vpop.permute.xlu1 %541  ;;  %v562_v17 = vpop.permute.xlu0 %561  ;;  %v583_v18 = vld [vmem:[#allocation3] sm:$0xf]  ;;  %v585_v23 = vld [vmem:[#allocation3 + $0x8] sm:$0xf] }
 0x1b1   : > { %545 = vst.msk [vmem:[#allocation2 + $0x8] sm:$0xf] %vm513_vm2, %v542_v16  ;;  %565 = vst.msk [vmem:[#allocation3 + $0xc] sm:$0xf] %vm513_vm2, %v562_v17  ;;  %v602_v19 = vsel %vm597_vm3, %v583_v18, 0  ;;  %v694_v25 = vsel %vm597_vm3, %v585_v23, 0 }
 0x1b2   : > { %1423 = vmatpush3.bf16.xpose.msra.mxu1 %v602_v19 }
 0x1b3   : > { %1434 = vmatprep.subr.bf16.mxu1 %v1850_v0 }
 0x1b4   : > { %v557_v20 = vpop.permute.xlu0 %556  ;;  %v584_v21 = vld [vmem:[#allocation3 + $0x4] sm:$0xf]  ;;  %v580_v27 = vld [vmem:[#allocation2 + $0x4] sm:$0xf] }
 0x1b5   : > { %560 = vst.msk [vmem:[#allocation2 + $0xc] sm:$0xf] %vm513_vm2, %v557_v20  ;;  %v648_v22 = vsel %vm597_vm3, %v584_v21, 0 }
 0x1b6   : > { %1429 = vmatpush3.bf16.xpose.msra.mxu0 %v648_v22 }
 0x1b7   : > { %1440 = vmatprep.subr.bf16.mxu0 %v1850_v0 }
 0x1b8   : > { %v586_v26 = vld [vmem:[#allocation3 + $0xc] sm:$0xf]  ;;  %v581_v29 = vld [vmem:[#allocation2 + $0x8] sm:$0xf] }
 0x1b9   : > { %1425 = vmatmul.mubr.msk.bf16.vlgmr.msra.gmra.mxu1 %vm597_vm3, %v579_v24  ;;  %v740_v28 = vsel %vm597_vm3, %v586_v26, 0 }
 0x1ba   : > { %1435 = vmatpush3.bf16.xpose.msra.mxu1 %v694_v25  ;;  %1436 = vmatprep.mubr.msk.bf16.mxu1 %vm1851_vm0, %v1850_v0 }
 0x1bb   : > { %1446 = vmatprep.subr.bf16.mxu1 %v1850_v0 }
 0x1bc   : > { %v582_v30 = vld [vmem:[#allocation2 + $0xc] sm:$0xf] }
 0x1bd   : > { %1431 = vmatmul.mubr.msk.bf16.vlgmr.msra.gmra.mxu0 %vm597_vm3, %v580_v27 }
 0x1be   : > { %1441 = vmatpush3.bf16.xpose.msra.mxu0 %v740_v28  ;;  %1442 = vmatprep.mubr.msk.bf16.mxu0 %vm1851_vm0, %v1850_v0 }
 0x1bf   : > { %1452 = vmatprep.subr.bf16.mxu0 %v1850_v0 }
 0x1c1   : > { %1437 = vmatmul.mubr.msk.bf16.vlgmr.msra.gmra.mxu1 %vm597_vm3, %v581_v29 }
 0x1c2   : > { %1448 = vmatprep.mubr.msk.bf16.mxu1 %vm1851_vm0, %v1850_v0 }
 0x1c5   : > { %1443 = vmatmul.mubr.msk.bf16.vlgmr.msra.gmra.mxu0 %vm597_vm3, %v582_v30 }
 0x1c6   : > { %1454 = vmatprep.mubr.msk.bf16.mxu0 %vm1851_vm0, %v1850_v0 }
 0x279   : > { %v638_v32 = vpop.f32.mrf.mxu1 }
 0x27a   : > { %v639_v33 = vadd.f32 %v1362_v31, %v638_v32 }
 0x27b   : > { %v1426_v34 = vpop.f32.mrf.mxu1 }
 0x27c   : > { %v782_v35 = vsel %vm597_vm3, %v639_v33, -inf }
 0x27d   : > { %783 = vmax.xlane.f32.xlu1 %v782_v35  ;;  %v641_v36 = vpop.f32.mrf.mxu1  ;;  %v684_v37 = vpop.f32.mrf.mxu0 }
 0x27e   : > { %v685_v38 = vadd.f32 %v1362_v31, %v684_v37 }
 0x27f   : > { %v1427_v39 = vpop.f32.mrf.mxu1  ;;  %v1432_v40 = vpop.f32.mrf.mxu0 }
 0x280   : > { %v785_v41 = vsel %vm597_vm3, %v685_v38, -inf }
 0x281   : > { %v730_v42 = vpop.f32.mrf.mxu1  ;;  %786 = vmax.xlane.f32.xlu0 %v785_v41  ;;  %v687_v43 = vpop.f32.mrf.mxu0 }
 0x282   : > { %v731_v44 = vadd.f32 %v1362_v31, %v730_v42 }
 0x283   : > { %v1433_v45 = vpop.f32.mrf.mxu0  ;;  %v1438_v46 = vpop.f32.mrf.mxu1 }
 0x284   : > { %v788_v47 = vsel %vm597_vm3, %v731_v44, -inf  ;;  %v1592_v45 = vld [vmem:[#allocation12 + $0x8] sm:$0xff]  }
 0x285   : > { %v733_v48 = vpop.f32.mrf.mxu1  ;;  %789 = vmax.xlane.f32.xlu0 %v788_v47  ;;  %v776_v49 = vpop.f32.mrf.mxu0 }
 0x286   : > { %v777_v50 = vadd.f32 %v1362_v31, %v776_v49  ;;  %v1593_v48 = vld [vmem:[#allocation12] sm:$0xff]  }
 0x287   : > { %v1439_v51 = vpop.f32.mrf.mxu1  ;;  %v1444_v52 = vpop.f32.mrf.mxu0 }
 0x288   : > { %v791_v53 = vsel %vm597_vm3, %v777_v50, -inf }
 0x289   : > { %792 = vmax.xlane.f32.xlu1 %v791_v53  ;;  %v779_v54 = vpop.f32.mrf.mxu0 }
 0x28b   : > { %v1445_v55 = vpop.f32.mrf.mxu0 }
 0x29a   : > { %536 = vrot.lane.b32.xlu1 %v2097_v9, %s1859_s24  ;;  %s1866_s24 = smov [#allocation15]  }
 0x29b   : > { %522 = vrot.lane.b32.xlu0 %v2097_v9, %s1860_s2 }
 0x306   : > { %v784_v56 = vpop.xlane.xlu1 %783 }
 0x307   : > { %v794_v57 = vsub.f32 %v639_v33, %v784_v56 }
 0x309   : > { %v798_v58 = vmul.f32 1.442695, %v794_v57 }
 0x30a   : > { %v787_v59 = vpop.xlane.xlu0 %786 }
 0x30b   : > { %1594 = vpow2.f32 %v798_v58  ;;  %v795_v60 = vsub.f32 %v685_v38, %v787_v59 }
 0x30d   : > { %v800_v61 = vmul.f32 1.442695, %v795_v60 }
 0x30e   : > { %v790_v62 = vpop.xlane.xlu0 %789 }
 0x30f   : > { %1596 = vpow2.f32 %v800_v61  ;;  %v796_v63 = vsub.f32 %v731_v44, %v790_v62 }
 0x311   : > { %v802_v1 = vmul.f32 1.442695, %v796_v63 }
 0x312   : > { %v523_v2 = vpop.permute.xlu0 %522  ;;  %v793_v4 = vpop.xlane.xlu1 %792 }
 0x313   : > { %1598 = vpow2.f32 %v802_v1  ;;  %525 = vst.msk [vmem:[#allocation4] sm:$0xf] %vm513_vm2, %v523_v2  ;;  %v797_v5 = vsub.f32 %v777_v50, %v793_v4 }
 0x315   : > { %v804_v6 = vmul.f32 1.442695, %v797_v5  ;;  %v1374_v5 = vld [vmem:[%s2279_s5] ss:$0 sm:$0xff] }
 0x316   : > { %v537_v7 = vpop.permute.xlu1 %536 }
 0x317   : > { %1600 = vpow2.f32 %v804_v6  ;;  %540 = vst.msk [vmem:[#allocation4 + $0x4] sm:$0xf] %vm513_vm2, %v537_v7 }
 0x318   : > { %v1595_v8 = vpop.eup %1594 }
 0x319   : > { %v806_v10 = vsel %vm597_vm3, %v1595_v8, 0.0 }
 0x31a   : > { %807 = vadd.xlane.f32.xlu0 %v806_v10  ;;  %v587_v11 = vld [vmem:[#allocation4] sm:$0xf] }
 0x31b   : > { %v840_v12 = vsel %vm838_vm4, %v587_v11, 0 }
 0x31c   : > { %v1597_v13 = vpop.eup %1596  ;;  %1447 = vmatpush3.bf16.msra.mxu1 %v840_v12 }
 0x31d   : > { %v809_v14 = vsel %vm597_vm3, %v1597_v13, 0.0  ;;  %1458 = vmatprep.subr.bf16.mxu1 %v1850_v0 }
 0x31e   : > { %810 = vadd.xlane.f32.xlu1 %v809_v14  ;;  %v588_v15 = vld [vmem:[#allocation4 + $0x4] sm:$0xf] }
 0x31f   : > { %v886_v16 = vsel %vm838_vm4, %v588_v15, 0 }
 0x320   : > { %v1599_v17 = vpop.eup %1598  ;;  %1453 = vmatpush3.bf16.msra.mxu0 %v886_v16 }
 0x321   : > { %v812_v18 = vsel %vm597_vm3, %v1599_v17, 0.0  ;;  %1464 = vmatprep.subr.bf16.mxu0 %v1850_v0 }
 0x322   : > { %813 = vadd.xlane.f32.xlu0 %v812_v18 }
 0x324   : > { %v1601_v19 = vpop.eup %1600 }
 0x325   : > { %v815_v20 = vsel %vm597_vm3, %v1601_v19, 0.0 }
 0x326   : > { %816 = vadd.xlane.f32.xlu1 %v815_v20 }
 0x337   : > { %551 = vrot.lane.b32.xlu1 %v2097_v9, %s1861_s25  ;;  %s1724_s25 = sshll.u32 %s1866_s24, 4  ;;  %s1725_s25 = int_to_ptr.vmem [resolvable:$false] %s1724_s25 }
 0x338   : > { %566 = vrot.lane.b32.xlu0 %v2097_v9, %s1862_s26  ;;  %s1726_s26 = scalar_lea.vmem %s1725_s25, 512  ;;  %p1727_p11 = scmp.lt.s32.totalorder %s2198_s29, %s1725_s25 }
 0x339   : > { %p1728_p5 = scmp.lt.s32.totalorder %s1726_s26, %s1720_s20 }
 0x33b   : > { %p1729_p10 = por %p1728_p5, %p1727_p11 }
 0x33d   : > { %p1730_p1 = pnand %p1729_p10, %p1723_p7 }
 0x3a3   : > { %v808_v21 = vpop.xlane.xlu0 %807 }
 0x3a4   : > { %1602 = vrcp.f32 %v808_v21 }
 0x3a7   : > { %v811_v22 = vpop.xlane.xlu1 %810 }
 0x3a8   : > { %1604 = vrcp.f32 %v811_v22 }
 0x3ab   : > { %v814_v23 = vpop.xlane.xlu0 %813 }
 0x3ac   : > { %1606 = vrcp.f32 %v814_v23 }
 0x3af   : > { %v567_v24 = vpop.permute.xlu0 %566  ;;  %v817_v25 = vpop.xlane.xlu1 %816 }
 0x3b0   : > { %570 = vst.msk [vmem:[#allocation4 + $0xc] sm:$0xf] %vm513_vm2, %v567_v24  ;;  %1608 = vrcp.f32 %v817_v25 }
 0x3b1   : > { %v1603_v26 = vpop.eup %1602 }
 0x3b2   : > { %v822_v27 = vmul.f32 %v1603_v26, %v1595_v8 }
 0x3b3   : > { %v552_v28 = vpop.permute.xlu1 %551 }
 0x3b4   : > { %555 = vst.msk [vmem:[#allocation4 + $0x8] sm:$0xf] %vm513_vm2, %v552_v28  ;;  %v826_v29 = vpack.c.bf16 %v822_v27, %v822_v27 }
 0x3b5   : > { %v1605_v30 = vpop.eup %1604 }
 0x3b6   : > { %831 = vst.msk [vmem:[%s2159_s30] sm:$0xf] %vm513_vm2, %v826_v29  ;;  %1449 = vmatmul.mubr.msk.bf16.vlgmr.msra.gmra.mxu1 %vm597_vm3, %v826_v29  ;;  %v823_v9 = vmul.f32 %v1605_v30, %v1597_v13 }
 0x3b7   : > { %v590_v31 = vld [vmem:[#allocation4 + $0xc] sm:$0xf]  ;;  %1460 = vmatprep.mubr.msk.bf16.mxu1 %vm1851_vm0, %v1850_v0 }
 0x3b8   : > { %v827_v32 = vpack.c.bf16 %v823_v9, %v823_v9  ;;  %v978_v33 = vsel %vm838_vm4, %v590_v31, 0 }
 0x3b9   : > { %v1607_v34 = vpop.eup %1606 }
 0x3ba   : > { %832 = vst.msk [vmem:[%s2159_s30 + $0x4] sm:$0xf] %vm513_vm2, %v827_v32  ;;  %1455 = vmatmul.mubr.msk.bf16.vlgmr.msra.gmra.mxu0 %vm597_vm3, %v827_v32  ;;  %v824_v35 = vmul.f32 %v1607_v34, %v1599_v17 }
 0x3bb   : > { %1465 = vmatpush3.bf16.msra.mxu0 %v978_v33  ;;  %v589_v36 = vld [vmem:[#allocation4 + $0x8] sm:$0xf]  ;;  %1466 = vmatprep.mubr.msk.bf16.mxu0 %vm1851_vm0, %v1850_v0 }
 0x3bc   : > { %v932_v37 = vsel %vm838_vm4, %v589_v36, 0  ;;  %v828_v38 = vpack.c.bf16 %v824_v35, %v824_v35 }
 0x3bd   : > { %v1609_v39 = vpop.eup %1608  ;;  %1459 = vmatpush3.bf16.msra.mxu1 %v932_v37 }
 0x3be   : > { %833 = vst.msk [vmem:[%s2159_s30 + $0x8] sm:$0xf] %vm513_vm2, %v828_v38  ;;  %v825_v40 = vmul.f32 %v1609_v39, %v1601_v19  ;;  %1470 = vmatprep.subr.bf16.mxu1 %v1850_v0 }
 0x3c0   : > { %1461 = vmatmul.mubr.msk.bf16.vlgmr.msra.gmra.mxu1 %vm597_vm3, %v828_v38  ;;  %v829_v41 = vpack.c.bf16 %v825_v40, %v825_v40 }
 0x3c1   : > { %1474 = vmatprep.mubr.msk.bf16.mxu1 %vm1851_vm0, %v1850_v0  ;;  %1471 = vmatpush3.bf16.msra.mxu1 %v1592_v45 }
 0x3c2   : > { %834 = vst.msk [vmem:[%s2159_s30 + $0xc] sm:$0xf] %vm513_vm2, %v829_v41  ;;  %1467 = vmatmul.mubr.msk.bf16.vlgmr.msra.gmra.mxu0 %vm597_vm3, %v829_v41  ;;  %1472 = vmatprep.subr.bf16.mxu1 %v1850_v0 }
 0x3c5   : > { %1473 = vmatpush3.bf16.msra.mxu1 %v1593_v48 }
 0x476   : > { %v876_v42 = vpop.f32.mrf.mxu1 }
 0x477   : > { %v1020_v43 = vpack.c.bf16 %v876_v42, %v876_v42 }
 0x478   : > { %v1450_v44 = vpop.f32.mrf.mxu1 }
 0x479   : > { %1021 = vst.msk [vmem:[#allocation5] sm:$0xf] %vm513_vm2, %v1020_v43 }
 0x47a   : > { %v879_v46 = vpop.f32.mrf.mxu1  ;;  %v922_v47 = vpop.f32.mrf.mxu0 }
 0x47b   : > { %v1388_v49 = vpack.c.bf16 %v922_v47, %v922_v47 }
 0x47c   : > { %v1451_v50 = vpop.f32.mrf.mxu1  ;;  %v1456_v51 = vpop.f32.mrf.mxu0 }
 0x47d   : > { %1026 = vrot.lane.b32.xlu1 %v1388_v49, %s1863_s14 }
 0x47e   : > { %v925_v52 = vpop.f32.mrf.mxu0 }
 0x480   : > { %v1457_v53 = vpop.f32.mrf.mxu0  ;;  %v968_v54 = vpop.f32.mrf.mxu1 }
 0x481   : > { %v1389_v55 = vpack.c.bf16 %v968_v54, %v968_v54 }
 0x482   : > { %v1462_v56 = vpop.f32.mrf.mxu1  ;;  %v1014_v57 = vpop.f32.mrf.mxu0 }
 0x483   : > { %v1390_v58 = vpack.c.bf16 %v1014_v57, %v1014_v57  ;;  %1035 = vrot.lane.b32.xlu0 %v1389_v55, %s1864_s18 }
 0x484   : > { %v971_v59 = vpop.f32.mrf.mxu1  ;;  %v1468_v60 = vpop.f32.mrf.mxu0 }
 0x485   : > { %1044 = vrot.lane.b32.xlu1 %v1390_v58, %s1865_s19 }
 0x486   : > { %v1463_v61 = vpop.f32.mrf.mxu1  ;;  %v1017_v0 = vpop.f32.mrf.mxu0 }
 0x488   : > { %v1469_v62 = vpop.f32.mrf.mxu0 }
 0x4ef   : > { %v1027_v63 = vpop.permute.xlu1 %1026 }
 0x4f0   : > { %1030 = vst.msk [vmem:[#allocation5] sm:$0xf] %vm1029_vm5, %v1027_v63 }
 0x4f5   : > { %v1036_v1 = vpop.permute.xlu0 %1035 }
 0x4f6   : > { %1039 = vst.msk [vmem:[#allocation5] sm:$0xf] %vm1038_vm6, %v1036_v1 }
 0x4f7   : > { %v1045_v2 = vpop.permute.xlu1 %1044 }
 0x4f8   : > { %1048 = vst.msk [vmem:[#allocation5] sm:$0xf] %vm1047_vm7, %v1045_v2 }
 0x4ff   : > { %v1049_v4 = vld [vmem:[#allocation5] sm:$0xf] }
 0x500   : > { %1475 = vmatmul.mubr.msk.bf16.vlgmr.msra.gmra.mxu1 %vm468_vm1, %v1049_v4 }
 0x5c0   : > { %v1111_v6 = vpop.f32.mrf.mxu1 }
 0x5c1   : > { %v1112_v7 = vadd.f32 %v1374_v5, %v1111_v6 }
 0x5c2   : > { %v1476_v8 = vpop.f32.mrf.mxu1 }
 0x5c3   : > { %v1117_v10 = vadd.f32 %v1112_v7, %v2085_v3 }
 0x5c4   : > { %v1114_v11 = vpop.f32.mrf.mxu1 }
 0x5c5   : > { %v1118_v12 = vsel %vm468_vm1, %v1117_v10, 0.0 }
 0x5c6   : > { %1119 = vadd.xlane.f32.xlu0 %v1118_v12  ;;  %v1477_v13 = vpop.f32.mrf.mxu1 }
 0x64f   : > { %v1120_v14 = vpop.xlane.xlu0 %1119 }
 0x650   : > { %v1122_v15 = vmul.f32 0.03125, %v1120_v14 }
 0x652   : > { %v1123_v16 = vsub.f32 %v1117_v10, %v1122_v15 }
 0x654   : > { %v1124_v17 = vmul.f32 %v1123_v16, %v1123_v16 }
 0x656   : > { %v1125_v18 = vsel %vm468_vm1, %v1124_v17, 0.0 }
 0x657   : > { %1126 = vadd.xlane.f32.xlu1 %v1125_v18 }
 0x658   : > { %1733 = shalt.err (!%p1730_p1)
}
 0x659   : > { %s1734_s11 = scalar_lea.hbm %s2196_s28, 256  ;;  %s1738_s18 = scalar_lea.hbm %s2283_s9, 512 }
 0x65a   : > { %p1735_p2 = scmp.ne.s32.totalorder %s2196_s28, %s1734_s11  ;;  %p1739_p13 = scmp.lt.s32.totalorder %s2196_s28, %s2283_s9 }
 0x65b   : > { %p1740_p0 = scmp.lt.s32.totalorder %s1738_s18, %s1734_s11 }
 0x65c   : > { %p1736_p6 = pnand %p1735_p2, %p2010_p9 }
 0x65d   : > { %p1741_p12 = por %p1740_p0, %p1739_p13 }
 0x65e   : > { %p1737_p8 = pneg %p1736_p6 }
 0x660   : > { %p1742_p4 = pnand %p1741_p12, %p1737_p8 }
 0x662   : > { %1745 = shalt.err (!%p1742_p4)
}
 0x663   : > { %s1867_s17 = smov 4   ;;  %v1378_v22 = vld [vmem:[%s2280_s6] ss:$0 sm:$0xff]  ;;  %s1382_s24 = sshll.u32 %s1834_s12, 7 }
 0x664   : > { %1491 = dma.vmem_to_hbm [thread:$0]  (%p2010_p9), %s2198_s29, 256, %s2196_s28, %s1155_s16, %s1860_s2, %s1860_s2, %s1867_s17  }
 0x665   : > { %v1379_v24 = vld [vmem:[%s2281_s7] ss:$0 sm:$0xff]  ;;  %s430_s25 = scalar_lea.vmem [#allocation14], %s1352_s4  ;;  %s1167_s16 = scalar_lea.hbm %s2282_s8, %s1382_s24 }
 0x666   : > { %s1169_s2 = sshll.u32 %s430_s25, 4  ;;  %s1150_s26 = scalar_lea.sflag [#allocation8], %s2055_s0  ;;  %s1170_s2 = int_to_ptr.vmem [resolvable:$true] %s1169_s2 }
 0x667   : > { %s1746_s11 = scalar_lea.vmem %s1170_s2, 128  ;;  %s1868_s30 = smov [#allocation14]  }
 0x668   : > { %p1747_p3 = scmp.ne.s32.totalorder %s1170_s2, %s1746_s11  ;;  %s1750_s12 = sshll.u32 %s1868_s30, 4  ;;  %s1751_s12 = int_to_ptr.vmem [resolvable:$false] %s1750_s12 }
 0x669   : > { %s1752_s4 = scalar_lea.vmem %s1751_s12, 256  ;;  %p1753_p5 = scmp.lt.s32.totalorder %s1170_s2, %s1751_s12 }
 0x66a   : > { %p1748_p7 = pnand %p1747_p3, %p2010_p9  ;;  %p1754_p10 = scmp.lt.s32.totalorder %s1752_s4, %s1746_s11 }
 0x66c   : > { %p1749_p11 = pneg %p1748_p7  ;;  %p1755_p1 = por %p1754_p10, %p1753_p5 }
 0x66e   : > { %p1756_p2 = pnand %p1755_p1, %p1749_p11 }
 0x6e0   : > { %v1127_v3 = vpop.xlane.xlu1 %1126 }
 0x6e1   : > { %v1128_v19 = vmul.f32 0.03125, %v1127_v3 }
 0x6e3   : > { %v1129_v20 = vadd.f32 1e-12, %v1128_v19 }
 0x6e5   : > { %1610 = vrsqrt.f32 %v1129_v20 }
 0x6f2   : > { %v1611_v21 = vpop.eup %1610 }
 0x6f3   : > { %v1131_v23 = vmul.f32 %v1611_v21, %v1123_v16 }
 0x6f5   : > { %v1139_v25 = vmul.f32 %v1378_v22, %v1131_v23 }
 0x6f7   : > { %v1147_v26 = vadd.f32 %v1379_v24, %v1139_v25 }
 0x6f9   : > { %1148 = vst.msk [vmem:[%s430_s25] sm:$0xff] %vm468_vm1, %v1147_v26 }
 0x6fa   : > { %1759 = shalt.err (!%p1756_p2)
}
 0x6fb   : > { %s1760_s14 = scalar_lea.hbm %s1167_s16, 128  ;;  %s1764_s19 = scalar_lea.hbm %s2282_s8, 256 }
 0x6fc   : > { %p1761_p6 = scmp.ne.s32.totalorder %s1167_s16, %s1760_s14  ;;  %p1765_p0 = scmp.lt.s32.totalorder %s1167_s16, %s2282_s8 }
 0x6fd   : > { %p1766_p12 = scmp.lt.s32.totalorder %s1764_s19, %s1760_s14 }
 0x6fe   : > { %p1762_p8 = pnand %p1761_p6, %p2010_p9 }
 0x6ff   : > { %p1767_p4 = por %p1766_p12, %p1765_p0 }
 0x700   : > { %p1763_p13 = pneg %p1762_p8 }
 0x702   : > { %p1768_p3 = pnand %p1767_p4, %p1763_p13 }
 0x704   : > { %1771 = shalt.err (!%p1768_p3)
}
 0x705   : > { %1490 = dma.vmem_to_hbm [thread:$0]  (%p2010_p9), %s1170_s2, 128, %s1167_s16, %s1150_s26  }
 0x706 PF: > { %s2314_s21 = sld [smem:[#allocation23_spill]] }
 0x707   : > { %s2315_s27 = sld [smem:[#allocation26_spill]] }
 0x708   : > { %s2316_s23 = sld [smem:[#allocation25_spill]] }
 0x70c   : > { %s1198_s20 = sand.u32 1, %s2314_s21  }
 0x70d   : > { %p2317_p7 = scmp.ne.s32.totalorder %s2315_s27, 0  ;;  %s1199_s24 = scalar_lea.sflag [#allocation8], %s1198_s20 }
 0x70e   : > { %p2318_p11 = scmp.ge.s32.totalorder %s2316_s23, 2 }
 0x710   : > { %p1509_p5 = pnand %p2318_p11, %p2317_p7 }
 0x712   : > { %p1510_p10 = pneg %p1509_p5 }
 0x714   : > { %1813 = dma.done.wait (%p1510_p10), %s1199_s24, 128  }
 0x715   : > { %1815 = vsyncadd (%p1510_p10), %s1199_s24, 4294967168  ;;  %s1208_s25 = scalar_lea.sflag [#allocation16], %s1198_s20 }
 0x716   : > { %1817 = dma.done.wait (%p1510_p10), %s1208_s25, 256  }
 0x717   : > { %1819 = vsyncadd (%p1510_p10), %s1208_s25, 4294967040  ;;  %s33_s14 = sadd.s32 1, %s2316_s23   ;;  %s2319_s22 = sld [smem:[#allocation24_spill]] }
 0x718   : > { %p30_p1 = scmp.ge.s32.totalorder %s33_s14, 4   ;;  %s2320_s11 = sld [smem:[#allocation28_spill]] }
 0x719   : > { %s2321_s2 = sld [smem:[#allocation27_spill]]  ;;  %s2322_s30 = smov %s1826_s10 }
 0x71a   : > { %s2324_s12 = smov %s1838_s13 }
 0x71b   :  { %32 = sbr.rel (!%p30_p1) target bundleno = 15 (0xf), region = 150 }
 0x71d   : > { %s2323_s10 = smov %s2319_s22 }
 0x71f   : > { %s2325_s13 = smov %s2321_s2 }
 0x720   :  { %1213 = vsyncpa [#allocation7], 1 }
 0x721   :  { %1215 = vsyncpa [#allocation7 + $0x1], 1 }
 0x722   :  { %1216 = vsyncpa [#allocation10], 1 }
 0x723   :  { %1218 = vsyncpa [#allocation10 + $0x1], 1 }
 0x724   :  { %1219 = vsyncpa [#allocation13], 1 }
 0x725   :  { %1220 = vsyncpa [#allocation8], 1 }
 0x726   :  { %1222 = vsyncpa [#allocation8 + $0x1], 1 }
 0x727   :  { %1223 = vsyncpa [#allocation16], 1 }
 0x728   :  { %1225 = vsyncpa [#allocation16 + $0x1], 1 }

</bundles_post_ra>
